<compile_context>
chip_gen: v6e
topology: v6e:2x2x1
jax: 0.10.0
libtpu: 0.0.40
codegen_flags: <defaults>
</compile_context>

<pallas_src>
import functools

import jax
import jax.numpy as jnp
from jax.experimental import pallas as pl
from jax.experimental.pallas import tpu as pltpu


# ---------------------------------------------------------------------------
# Kernels
# ---------------------------------------------------------------------------

def _bn_fused_kernel(x_ref, p_ref, o_ref, *, eps, count):
    """Single-sweep BN when the whole (R, C) slab fits in VMEM.

    x_ref: (R, C)  rows = N*H*W on sublanes, channels on lanes
    p_ref: (2, C)  row 0 = gamma, row 1 = beta
    o_ref: (R, C)
    """
    inv_r = 1.0 / count
    x = x_ref[...].astype(jnp.float32)
    # Per-channel stats: pure sublane reduction (VALU adds, no XLU lane work).
    s1 = jnp.sum(x, axis=0, keepdims=True)            # (1, C)
    s2 = jnp.sum(x * x, axis=0, keepdims=True)        # (1, C)

    mean = s1 * inv_r
    var = jnp.maximum(s2 * inv_r - mean * mean, 0.0)   # biased variance
    inv_std = jax.lax.rsqrt(var + eps)

    p = p_ref[...].astype(jnp.float32)                 # (2, C)
    scale = p[0:1, :] * inv_std                        # (1, C)
    shift = p[1:2, :] - mean * scale                   # (1, C)

    # Re-read x for the normalize so the f32 copy above need not stay live
    # across the whole body (relevant for bf16 inputs / large tiles).
    o_ref[...] = (x_ref[...].astype(jnp.float32) * scale + shift).astype(o_ref.dtype)


def _bn_stats_kernel(x_ref, s1_ref, s2_ref):
    """Accumulate per-channel sum / sum-of-squares over row blocks.

    Output blocks map to block (0, 0) on every grid step, so they stay
    VMEM-resident across the reduction axis (accumulator pattern).
    """
    @pl.when(pl.program_id(0) == 0)
    def _():
        s1_ref[...] = jnp.zeros_like(s1_ref)
        s2_ref[...] = jnp.zeros_like(s2_ref)

    x = x_ref[...].astype(jnp.float32)
    s1_ref[...] += jnp.sum(x, axis=0, keepdims=True)
    s2_ref[...] += jnp.sum(x * x, axis=0, keepdims=True)


def _bn_norm_kernel(x_ref, s1_ref, s2_ref, p_ref, o_ref, *, eps, count):
    """Row-parallel normalize: y = x * scale + shift (folded affine)."""
    inv_r = 1.0 / count
    mean = s1_ref[...] * inv_r
    var = jnp.maximum(s2_ref[...] * inv_r - mean * mean, 0.0)
    inv_std = jax.lax.rsqrt(var + eps)

    p = p_ref[...].astype(jnp.float32)
    scale = p[0:1, :] * inv_std
    shift = p[1:2, :] - mean * scale

    o_ref[...] = (x_ref[...].astype(jnp.float32) * scale + shift).astype(o_ref.dtype)


# ---------------------------------------------------------------------------
# VMEM / tiling helpers (padding- and generation-aware)
# ---------------------------------------------------------------------------

def _sublane_mult(dtype):
    it = jnp.dtype(dtype).itemsize
    return {4: 8, 2: 16, 1: 32}.get(it, 8)


def _phys_tile_bytes(rows, cols, dtype):
    """Physical VMEM bytes of a (rows, cols) tile incl. (sublane, 128) padding."""
    it = jnp.dtype(dtype).itemsize
    sub = _sublane_mult(dtype)
    return (pl.cdiv(max(rows, 1), sub) * sub) * (pl.cdiv(max(cols, 1), 128) * 128) * it


def _vmem_caps():
    """(per-step tile budget, explicit scoped-VMEM limit), generation-aware."""
    cap = 64 << 20                       # conservative default (v7x per-TC VMEM)
    try:
        info = pltpu.get_tpu_info()
        cap = int(getattr(info, "vmem_capacity_bytes", cap)) or cap
    except Exception:
        pass
    budget = max(4 << 20, int(cap * 0.35))   # ~22 MiB on v7x, ~45 MiB on v5e/v6e
    limit = min(int(cap * 0.9), 96 << 20)    # always below physical VMEM
    return budget, limit


def _pick_row_block(r, c, x_dtype, out_dtype, budget):
    """Largest power-of-two multiple of the sublane packing whose double-
    buffered in+out tiles (plus the small stats/params blocks) fit the budget."""
    sub = _sublane_mult(x_dtype)
    small = 6 * _phys_tile_bytes(2, c, jnp.float32)
    best = sub
    tr = sub
    while tr < r:
        need = (2 * _phys_tile_bytes(tr, c, x_dtype)
                + 2 * _phys_tile_bytes(tr, c, out_dtype)
                + small)
        if need > budget:
            break
        best = tr
        tr *= 2
    return best


# ---------------------------------------------------------------------------
# Wrapper
# ---------------------------------------------------------------------------

def batchnorm2d_pallas(x_nchw, gamma, beta, eps=1e-5, row_block=None):
    """Training-mode BatchNorm2d forward. x_nchw: (N, C, H, W); gamma/beta: (C,)."""
    n, c, h, w = x_nchw.shape
    r = n * h * w
    count = float(r)

    # Lane-dense NHWC slab: channels on the 128-lane axis, rows on sublanes.
    x2 = jnp.transpose(x_nchw, (0, 2, 3, 1)).reshape(r, c)
    params = jnp.stack([gamma, beta], axis=0)               # (2, C)

    budget, vmem_limit = _vmem_caps()

    fused_bytes = (6 * _phys_tile_bytes(r, c, jnp.float32)
                   + 4 * _phys_tile_bytes(2, c, jnp.float32))
    use_fused = (row_block is None) and (fused_bytes <= budget)

    if use_fused:
        out2 = pl.pallas_call(
            functools.partial(_bn_fused_kernel, eps=eps, count=count),
            out_shape=jax.ShapeDtypeStruct((r, c), x_nchw.dtype),
            grid=(1,),
            in_specs=[
                pl.BlockSpec((r, c), lambda i: (0, 0)),
                pl.BlockSpec((2, c), lambda i: (0, 0)),
            ],
            out_specs=pl.BlockSpec((r, c), lambda i: (0, 0)),
            compiler_params=pltpu.CompilerParams(
                dimension_semantics=("arbitrary",),
                vmem_limit_bytes=vmem_limit,
            ),
        )(x2, params)
        return jnp.transpose(out2.reshape(n, h, w, c), (0, 3, 1, 2))

    # ---- Tiled path: stats reduction + row-parallel normalize --------------
    sub = _sublane_mult(x_nchw.dtype)
    if row_block is not None:
        tr = max(sub, (int(row_block) // sub) * sub)
    else:
        tr = _pick_row_block(r, c, x_nchw.dtype, x_nchw.dtype, budget)

    r_pad = pl.cdiv(r, tr) * tr
    if r_pad != r:
        # Zero rows contribute 0 to sum / sum(x^2); we still divide by the
        # true count, and padded output rows are sliced off below.
        x2 = jnp.pad(x2, ((0, r_pad - r), (0, 0)))
    grid = (r_pad // tr,)

    s1, s2 = pl.pallas_call(
        _bn_stats_kernel,
        out_shape=(jax.ShapeDtypeStruct((1, c), jnp.float32),
                   jax.ShapeDtypeStruct((1, c), jnp.float32)),
        grid=grid,
        in_specs=[pl.BlockSpec((tr, c), lambda i: (i, 0))],
        out_specs=(pl.BlockSpec((1, c), lambda i: (0, 0)),
                   pl.BlockSpec((1, c), lambda i: (0, 0))),
        compiler_params=pltpu.CompilerParams(
            dimension_semantics=("arbitrary",),      # reduction axis
            vmem_limit_bytes=vmem_limit,
        ),
    )(x2)

    out2 = pl.pallas_call(
        functools.partial(_bn_norm_kernel, eps=eps, count=count),
        out_shape=jax.ShapeDtypeStruct((r_pad, c), x_nchw.dtype),
        grid=grid,
        in_specs=[
            pl.BlockSpec((tr, c), lambda i: (i, 0)),
            pl.BlockSpec((1, c), lambda i: (0, 0)),
            pl.BlockSpec((1, c), lambda i: (0, 0)),
            pl.BlockSpec((2, c), lambda i: (0, 0)),
        ],
        out_specs=pl.BlockSpec((tr, c), lambda i: (i, 0)),
        compiler_params=pltpu.CompilerParams(
            # Row blocks are independent; this path always has grid >= 2, so
            # v7x's two TensorCores can split it.
            dimension_semantics=("parallel",),
            vmem_limit_bytes=vmem_limit,
        ),
    )(x2, s1, s2, params)

    out2 = out2[:r]
    return jnp.transpose(out2.reshape(n, h, w, c), (0, 3, 1, 2))


if __name__ == "__main__":
    key = jax.random.PRNGKey(0)
    kx, kg, kb, kx2, kg2, kb2 = jax.random.split(key, 6)

    def ref_bn(x, g, b, eps=1e-5):
        mean = jnp.mean(x, axis=(0, 2, 3), keepdims=True)
        var = jnp.mean((x - mean) ** 2, axis=(0, 2, 3), keepdims=True)
        cc = x.shape[1]
        return ((x - mean) / jnp.sqrt(var + eps) * g.reshape(1, cc, 1, 1)
                + b.reshape(1, cc, 1, 1))

    # Module shape: BatchNorm2d(272) on (1, 272, 7, 7) -> fused single-sweep path.
    N, C, H, W = 1, 272, 7, 7
    x = jax.random.normal(kx, (N, C, H, W), dtype=jnp.float32)
    # PyTorch init is weight=1, bias=0; perturb so the affine path is exercised.
    gamma = 1.0 + 0.1 * jax.random.normal(kg, (C,), dtype=jnp.float32)
    beta = 0.1 * jax.random.normal(kb, (C,), dtype=jnp.float32)

    out = jax.block_until_ready(batchnorm2d_pallas(x, gamma, beta))
    ref = ref_bn(x, gamma, beta)
    assert out.shape == x.shape and out.dtype == x.dtype
    assert jnp.max(jnp.abs(out - ref)) < 1e-4

    # Also exercise the tiled (stats + normalize) path, including row padding.
    N2, C2, H2, W2 = 2, 32, 15, 15       # R = 450 -> padded to 512 with row_block=128
    x2 = jax.random.normal(kx2, (N2, C2, H2, W2), dtype=jnp.float32)
    g2 = 1.0 + 0.1 * jax.random.normal(kg2, (C2,), dtype=jnp.float32)
    b2 = 0.1 * jax.random.normal(kb2, (C2,), dtype=jnp.float32)
    out2 = jax.block_until_ready(batchnorm2d_pallas(x2, g2, b2, row_block=128))
    ref2 = ref_bn(x2, g2, b2)
    assert out2.shape == x2.shape
    assert jnp.max(jnp.abs(out2 - ref2)) < 1e-4

    print("KERNEL_OK")
</pallas_src>

<mosaic_0001>
module attributes {stable_mosaic.version = 11 : i64} {
  func.func @_bn_fused_kernel(%arg0: i32, %arg1: memref<49x272xf32, #tpu.memory_space<vmem>>, %arg2: memref<2x272xf32, #tpu.memory_space<vmem>>, %arg3: memref<49x272xf32, #tpu.memory_space<vmem>>) attributes {dimension_semantics = [#tpu.dimension_semantics<arbitrary>], iteration_bounds = array<i64: 1>, scalar_prefetch = 0 : i64, scratch_operands = 0 : i64, tpu.core_type = #tpu.core_type<tc>, window_params = [{pipeline_mode = #tpu.pipeline_mode<synchronous>, transform_indices = @transform_0, window_bounds = array<i64: 49, 272>}, {pipeline_mode = #tpu.pipeline_mode<synchronous>, transform_indices = @transform_1, window_bounds = array<i64: 2, 272>}, {pipeline_mode = #tpu.pipeline_mode<synchronous>, transform_indices = @transform_2, window_bounds = array<i64: 49, 272>}]} {
    %c0 = arith.constant 0 : index
    %c0_0 = arith.constant 0 : index
    %0 = vector.load %arg1[%c0, %c0_0] : memref<49x272xf32, #tpu.memory_space<vmem>>, vector<49x272xf32>
    %cst = arith.constant dense<0.000000e+00> : vector<272xf32>
    %1 = vector.multi_reduction <add>, %0, %cst [0] : vector<49x272xf32> to vector<272xf32>
    %2 = vector.shape_cast %1 : vector<272xf32> to vector<1x272xf32>
    %3 = arith.mulf %0, %0 : vector<49x272xf32>
    %cst_1 = arith.constant dense<0.000000e+00> : vector<272xf32>
    %4 = vector.multi_reduction <add>, %3, %cst_1 [0] : vector<49x272xf32> to vector<272xf32>
    %5 = vector.shape_cast %4 : vector<272xf32> to vector<1x272xf32>
    %cst_2 = arith.constant 0.0204081628 : f32
    %6 = vector.broadcast %cst_2 : f32 to vector<1x272xf32>
    %7 = arith.mulf %2, %6 : vector<1x272xf32>
    %cst_3 = arith.constant 0.0204081628 : f32
    %8 = vector.broadcast %cst_3 : f32 to vector<1x272xf32>
    %9 = arith.mulf %5, %8 : vector<1x272xf32>
    %10 = arith.mulf %7, %7 : vector<1x272xf32>
    %11 = arith.subf %9, %10 : vector<1x272xf32>
    %cst_4 = arith.constant 0.000000e+00 : f32
    %12 = vector.broadcast %cst_4 : f32 to vector<1x272xf32>
    %13 = arith.maximumf %11, %12 : vector<1x272xf32>
    %cst_5 = arith.constant 9.99999974E-6 : f32
    %14 = vector.broadcast %cst_5 : f32 to vector<1x272xf32>
    %15 = arith.addf %13, %14 : vector<1x272xf32>
    %16 = math.rsqrt %15 : vector<1x272xf32>
    %c0_6 = arith.constant 0 : index
    %c0_7 = arith.constant 0 : index
    %17 = vector.load %arg2[%c0_6, %c0_7] : memref<2x272xf32, #tpu.memory_space<vmem>>, vector<2x272xf32>
    %18 = vector.extract_strided_slice %17 {offsets = [0, 0], sizes = [1, 272], strides = [1, 1]} : vector<2x272xf32> to vector<1x272xf32>
    %19 = arith.mulf %18, %16 : vector<1x272xf32>
    %20 = vector.extract_strided_slice %17 {offsets = [1, 0], sizes = [1, 272], strides = [1, 1]} : vector<2x272xf32> to vector<1x272xf32>
    %21 = arith.mulf %7, %19 : vector<1x272xf32>
    %22 = arith.subf %20, %21 : vector<1x272xf32>
    %c0_8 = arith.constant 0 : index
    %c0_9 = arith.constant 0 : index
    %23 = vector.load %arg1[%c0_8, %c0_9] : memref<49x272xf32, #tpu.memory_space<vmem>>, vector<49x272xf32>
    %24 = vector.broadcast %19 : vector<1x272xf32> to vector<49x272xf32>
    %25 = arith.mulf %23, %24 : vector<49x272xf32>
    %26 = vector.broadcast %22 : vector<1x272xf32> to vector<49x272xf32>
    %27 = arith.addf %25, %26 : vector<49x272xf32>
    %c0_10 = arith.constant 0 : index
    %c0_11 = arith.constant 0 : index
    %28 = vector.load %arg3[%c0_10, %c0_11] : memref<49x272xf32, #tpu.memory_space<vmem>>, vector<49x272xf32>
    tpu.vector_store %arg3[%c0_10, %c0_11], %27 {strides = array<i32>} : memref<49x272xf32, #tpu.memory_space<vmem>>, vector<49x272xf32>,
    return
  }
  func.func @transform_0(%arg0: i32) -> (i32, i32) {
    %c0_i32 = arith.constant 0 : i32
    %c0_i32_0 = arith.constant 0 : i32
    %c0_i32_1 = arith.constant 0 : i32
    return %c0_i32, %c0_i32_0 : i32, i32
  }
  func.func @transform_1(%arg0: i32) -> (i32, i32) {
    %c0_i32 = arith.constant 0 : i32
    %c0_i32_0 = arith.constant 0 : i32
    %c0_i32_1 = arith.constant 0 : i32
    return %c0_i32, %c0_i32_0 : i32, i32
  }
  func.func @transform_2(%arg0: i32) -> (i32, i32) {
    %c0_i32 = arith.constant 0 : i32
    %c0_i32_0 = arith.constant 0 : i32
    %c0_i32_1 = arith.constant 0 : i32
    return %c0_i32, %c0_i32_0 : i32, i32
  }
}

</mosaic_0001>

<bundles_post_ra>
// kernel: tpu_custom_call.1
= control target key start
LH: loop header
LB: loop body
LE: loop exit
PB: predicated region body
PF: predicated region fallthrough
CT: control target
= control target key end

     0   :  { %7 = vsyncpa [#allocation3], 0  ;;  %s643_s0 = inlined_call_operand.hbm [shape: f32[49,272], index: 0, kind: input, shape index: {}]   ;;  %s644_s1 = inlined_call_operand.hbm [shape: f32[2,272], index: 1, kind: input, shape index: {}]   ;;  %s645_s2 = inlined_call_operand.hbm [shape: f32[49,272], index: 2, kind: output, shape index: {}]  }
   0x1   :  { %8 = vsyncpa [#allocation6], 0 }
   0x2   :  { %9 = vsyncpa [#allocation4], 0  ;;  %s456_s9 = smov [#allocation2]  }
   0x3   :  { %s15_s10 = sshll.u32 %s456_s9, 4  ;;  %s16_s10 = int_to_ptr.vmem [resolvable:$true] %s15_s10 }
   0x4   :  { %s398_s11 = scalar_lea.vmem %s16_s10, 2688  ;;  %p403_p1 = scmp.lt.s32.totalorder %s16_s10, %s16_s10 }
   0x5   :  { %p399_p0 = scmp.ne.s32.totalorder %s16_s10, %s398_s11  ;;  %p404_p2 = scmp.lt.s32.totalorder %s398_s11, %s398_s11 }
   0x7   :  { %p405_p3 = por %p404_p2, %p403_p1 }
   0x9   :  { %p406_p4 = pnand %p405_p3, %p399_p0 }
   0xb   :  { %409 = shalt.err (!%p406_p4)
}
   0xc   :  { %s457_s12 = smov 384   ;;  %s458_s13 = smov 24  }
   0xd   :  { %21 = dma.hbm_to_vmem [thread:$0]  %s643_s0, 2688, %s16_s10, [#allocation3], %s457_s12, %s457_s12, %s458_s13  }
   0xe   :  { %s459_s16 = smov [#allocation5]  }
   0xf   :  { %s28_s17 = sshll.u32 %s459_s16, 4  ;;  %s29_s17 = int_to_ptr.vmem [resolvable:$true] %s28_s17 }
  0x10   :  { %s418_s18 = scalar_lea.vmem %s29_s17, 96  ;;  %p423_p6 = scmp.lt.s32.totalorder %s29_s17, %s29_s17 }
  0x11   :  { %p419_p5 = scmp.ne.s32.totalorder %s29_s17, %s418_s18  ;;  %p424_p7 = scmp.lt.s32.totalorder %s418_s18, %s418_s18 }
  0x13   :  { %p425_p8 = por %p424_p7, %p423_p6 }
  0x15   :  { %p426_p9 = pnand %p425_p8, %p419_p5 }
  0x17   :  { %429 = shalt.err (!%p426_p9)
}
  0x18   :  { %31 = dma.hbm_to_vmem [thread:$0]  %s644_s1, 96, %s29_s17, [#allocation6]  }
  0x19   :  { %450 = dma.done.wait [#allocation3], 2688  }
  0x1a   :  { %451 = vsyncadd [#allocation3], 4294964608 }
  0x1b   :  { %452 = dma.done.wait [#allocation6], 96  }
  0x1c   :  { %453 = vsyncadd [#allocation6], 4294967200  ;;  %vm86_vm0 = vcmask 130048   ;;  %v486_v0 = vld [vmem:[#allocation2] sm:$0xff]  ;;  %v488_v1 = vld [vmem:[#allocation2 + $0x8] sm:$0xff]  ;;  %vm64_vm1 = vcmask 1040384  }
  0x1d   :  { %v490_v2 = vld [vmem:[#allocation2 + $0x10] sm:$0xff]  ;;  %v492_v3 = vld [vmem:[#allocation2 + $0x18] sm:$0xff]  ;;  %v494_v4 = vld [vmem:[#allocation2 + $0x20] sm:$0xff]  ;;  %vm98_vm2 = vcmask 122880   ;;  %v107_v7 = vmul.f32 %v486_v0, %v486_v0  ;;  %v108_v14 = vmul.f32 %v488_v1, %v488_v1  ;;  %s461_s0 = smov [#allocation7]  }
  0x1e   :  { %v496_v5 = vld [vmem:[#allocation2 + $0x28] sm:$0xff]  ;;  %v87_v6 = vsel %vm86_vm0, %v490_v2, 0.0  ;;  %v502_v8 = vld [vmem:[#allocation2 + $0x30] sm:$0xff]  ;;  %v504_v9 = vld [vmem:[#allocation2 + $0x38] sm:$0xff]  ;;  %v59_v11 = vadd.f32 %v492_v3, %v486_v0  ;;  %v73_v12 = vadd.f32 %v494_v4, %v488_v1  ;;  %v109_v20 = vmul.f32 %v490_v2, %v490_v2  ;;  %s365_s1 = sshll.u32 %s461_s0, 4  ;;  %s366_s1 = int_to_ptr.vmem [resolvable:$true] %s365_s1 }
  0x1f   :  { %v506_v10 = vld [vmem:[#allocation2 + $0x40] sm:$0xff]  ;;  %v88_v13 = vsel %vm86_vm0, %v496_v5, 0.0  ;;  %v516_v15 = vld [vmem:[#allocation2 + $0x48] sm:$0xff]  ;;  %v518_v16 = vld [vmem:[#allocation2 + $0x50] sm:$0xff]  ;;  %v110_v21 = vmul.f32 %v492_v3, %v492_v3  ;;  %v111_v26 = vmul.f32 %v494_v4, %v494_v4  ;;  %v112_v32 = vmul.f32 %v496_v5, %v496_v5  ;;  %s430_s21 = scalar_lea.vmem %s366_s1, 2688  ;;  %p435_p11 = scmp.lt.s32.totalorder %s366_s1, %s366_s1 }
  0x20   :  { %v520_v17 = vld [vmem:[#allocation2 + $0x58] sm:$0xff]  ;;  %v89_v18 = vadd.f32 %v88_v13, %v87_v6  ;;  %v90_v19 = vsel %vm86_vm0, %v506_v10, 0.0  ;;  %v528_v22 = vld [vmem:[#allocation2 + $0x70] sm:$0xff]  ;;  %v60_v23 = vadd.f32 %v59_v11, %v502_v8  ;;  %v74_v24 = vadd.f32 %v73_v12, %v504_v9  ;;  %v536_v27 = vld [vmem:[#allocation2 + $0x60] sm:$0xff]  ;;  %p431_p10 = scmp.ne.s32.totalorder %s366_s1, %s430_s21  ;;  %p436_p12 = scmp.lt.s32.totalorder %s430_s21, %s430_s21 }
  0x21   :  { %v92_v25 = vsel %vm86_vm0, %v520_v17, 0.0  ;;  %v538_v28 = vld [vmem:[#allocation2 + $0x68] sm:$0xff]  ;;  %v94_v31 = vsel %vm86_vm0, %v528_v22, 0.0  ;;  %v113_v33 = vmul.f32 %v502_v8, %v502_v8  ;;  %v548_v34 = vld [vmem:[#allocation2 + $0x90] sm:$0x1]  ;;  %v114_v39 = vmul.f32 %v504_v9, %v504_v9  ;;  %v560_v41 = vld [vmem:[#allocation2 + $0x78] sm:$0xff] }
  0x22   :  { %v540_v29 = vld [vmem:[#allocation2 + $0x88] sm:$0xff]  ;;  %v91_v30 = vadd.f32 %v90_v19, %v89_v18  ;;  %v550_v35 = vld [vmem:[#allocation2 + $0x98] sm:$0x1]  ;;  %v552_v36 = vld [vmem:[#allocation2 + $0xa0] sm:$0x1]  ;;  %v61_v37 = vadd.f32 %v60_v23, %v516_v15  ;;  %v75_v38 = vadd.f32 %v74_v24, %v518_v16  ;;  %v115_v40 = vmul.f32 %v506_v10, %v506_v10  ;;  %p437_p13 = por %p436_p12, %p435_p11 }
  0x23   :  { %v562_v42 = vld [vmem:[#allocation2 + $0x80] sm:$0xff]  ;;  %v65_v43 = vsel %vm64_vm1, %v548_v34, 0.0  ;;  %v116_v45 = vmul.f32 %v516_v15, %v516_v15  ;;  %v117_v46 = vmul.f32 %v518_v16, %v518_v16  ;;  %v78_v49 = vsel %vm64_vm1, %v550_v35, 0.0 }
  0x24   :  { %v93_v44 = vadd.f32 %v92_v25, %v91_v30  ;;  %v62_v47 = vadd.f32 %v61_v37, %v536_v27  ;;  %v76_v48 = vadd.f32 %v75_v38, %v538_v28  ;;  %v96_v50 = vsel %vm86_vm0, %v540_v29, 0.0  ;;  %p438_p0 = pnand %p437_p13, %p431_p10 }
  0x25   :  { %v99_v52 = vsel %vm98_vm2, %v552_v36, 0.0  ;;  %v118_v53 = vmul.f32 %v520_v17, %v520_v17  ;;  %v119_v54 = vmul.f32 %v536_v27, %v536_v27  ;;  %v120_v57 = vmul.f32 %v538_v28, %v538_v28 }
  0x26   :  { %v95_v51 = vadd.f32 %v94_v31, %v93_v44  ;;  %v63_v55 = vadd.f32 %v62_v47, %v560_v41  ;;  %v77_v56 = vadd.f32 %v76_v48, %v562_v42  ;;  %v121_v58 = vmul.f32 %v528_v22, %v528_v22 }
  0x27   :  { %v122_v60 = vmul.f32 %v560_v41, %v560_v41  ;;  %v123_v61 = vmul.f32 %v562_v42, %v562_v42  ;;  %v124_v62 = vmul.f32 %v540_v29, %v540_v29  ;;  %v125_v11 = vmul.f32 %v548_v34, %v548_v34 }
  0x28   :  { %v97_v59 = vadd.f32 %v96_v50, %v95_v51  ;;  %v66_v63 = vadd.f32 %v65_v43, %v63_v55  ;;  %v79_v6 = vadd.f32 %v78_v49, %v77_v56  ;;  %v128_v12 = vadd.f32 %v110_v21, %v107_v7 }
  0x29   :  { %v126_v18 = vmul.f32 %v550_v35, %v550_v35  ;;  %v127_v19 = vmul.f32 %v552_v36, %v552_v36  ;;  %v141_v23 = vadd.f32 %v111_v26, %v108_v14  ;;  %v154_v31 = vsel %vm86_vm0, %v109_v20, 0.0 }
  0x2a   :  { %v100_v13 = vadd.f32 %v99_v52, %v97_v59  ;;  %v67_v24 = vrot.slane %v66_v63, 4  ;;  %v80_v25 = vrot.slane %v79_v6, 4  ;;  %v129_v30 = vadd.f32 %v128_v12, %v113_v33 }
  0x2b   :  { %v142_v38 = vadd.f32 %v141_v23, %v114_v39  ;;  %v155_v43 = vsel %vm86_vm0, %v112_v32, 0.0  ;;  %v157_v44 = vsel %vm86_vm0, %v115_v40, 0.0  ;;  %v133_v50 = vsel %vm64_vm1, %v125_v11, 0.0 }
  0x2c   :  { %v101_v37 = vrot.slane %v100_v13, 4  ;;  %v68_v7 = vadd.f32 %v67_v24, %v66_v63  ;;  %v81_v21 = vadd.f32 %v80_v25, %v79_v6  ;;  %v130_v47 = vadd.f32 %v129_v30, %v116_v45 }
  0x2d   :  { %v156_v48 = vadd.f32 %v155_v43, %v154_v31  ;;  %v143_v51 = vadd.f32 %v142_v38, %v117_v46  ;;  %v159_v14 = vsel %vm86_vm0, %v118_v53, 0.0  ;;  %v146_v32 = vsel %vm64_vm1, %v126_v18, 0.0 }
  0x2e   :  { %v102_v49 = vadd.f32 %v101_v37, %v100_v13  ;;  %v69_v26 = vrot.slane %v68_v7, 2  ;;  %v82_v33 = vrot.slane %v81_v21, 2  ;;  %v131_v52 = vadd.f32 %v130_v47, %v119_v54 }
  0x2f   :  { %v158_v20 = vadd.f32 %v157_v44, %v156_v48  ;;  %v144_v39 = vadd.f32 %v143_v51, %v120_v57  ;;  %v161_v40 = vsel %vm86_vm0, %v121_v58, 0.0  ;;  %v163_v11 = vsel %vm86_vm0, %v124_v62, 0.0 }
  0x30   :  { %v103_v55 = vrot.slane %v102_v49, 2  ;;  %v70_v56 = vadd.f32 %v69_v26, %v68_v7  ;;  %v83_v59 = vadd.f32 %v82_v33, %v81_v21  ;;  %v132_v45 = vadd.f32 %v131_v52, %v122_v60 }
  0x31   :  { %v160_v63 = vadd.f32 %v159_v14, %v158_v20  ;;  %v145_v6 = vadd.f32 %v144_v39, %v123_v61  ;;  %v165_v24 = vsel %vm98_vm2, %v127_v19, 0.0 }
  0x32   :  { %v71_v46 = vrot.slane %v70_v56, 1  ;;  %v104_v12 = vadd.f32 %v103_v55, %v102_v49  ;;  %v134_v53 = vadd.f32 %v133_v50, %v132_v45  ;;  %v84_v23 = vrot.slane %v83_v59, 1 }
  0x33   :  { %v162_v13 = vadd.f32 %v161_v40, %v160_v63  ;;  %v147_v54 = vadd.f32 %v146_v32, %v145_v6 }
  0x34   :  { %v135_v57 = vrot.slane %v134_v53, 4  ;;  %v72_v30 = vadd.f32 %v71_v46, %v70_v56  ;;  %v105_v58 = vrot.slane %v104_v12, 1  ;;  %v85_v60 = vadd.f32 %v84_v23, %v83_v59 }
  0x35   :  { %v164_v25 = vadd.f32 %v163_v11, %v162_v13  ;;  %v148_v18 = vrot.slane %v147_v54, 4 }
  0x36   :  { %v136_v31 = vadd.f32 %v135_v57, %v134_v53  ;;  %v106_v44 = vadd.f32 %v105_v58, %v104_v12  ;;  %v173_v47 = vmul.f32 0.020408163, %v72_v30  ;;  %v174_v49 = vmul.f32 0.020408163, %v85_v60 }
  0x37   :  { %v166_v37 = vadd.f32 %v165_v24, %v164_v25  ;;  %v149_v38 = vadd.f32 %v148_v18, %v147_v54  ;;  %v460_v24 = vmov 1983009808   ;;  %v202_v25 = vlaneseq }
  0x38   :  { %v137_v61 = vrot.slane %v136_v31, 2  ;;  %v175_v33 = vmul.f32 0.020408163, %v106_v44  ;;  %v179_v52 = vmul.f32 %v173_v47, %v173_v47  ;;  %v180_v55 = vmul.f32 %v174_v49, %v174_v49 }
  0x39   :  { %v167_v43 = vrot.slane %v166_v37, 4  ;;  %v150_v62 = vrot.slane %v149_v38, 2  ;;  %v200_v57 = vunpack.c.l.s4 %v460_v24  ;;  %v203_v30 = vshrl.u32 %v202_v25, 7 }
  0x3a   :  { %v138_v7 = vadd.f32 %v137_v61, %v136_v31  ;;  %v181_v59 = vmul.f32 %v175_v33, %v175_v33 }
  0x3b   :  { %v168_v21 = vadd.f32 %v167_v43, %v166_v37  ;;  %v151_v48 = vadd.f32 %v150_v62, %v149_v38  ;;  %v201_v18 = vunpack.c.0.s8 %v200_v57  ;;  %v194_v62 = vld [vmem:[#allocation5] sm:$0x3f] }
  0x3c   :  { %v139_v50 = vrot.slane %v138_v7, 1 }
  0x3d   :  { %v169_v19 = vrot.slane %v168_v21, 2  ;;  %v152_v51 = vrot.slane %v151_v48, 1  ;;  %v204_v31 = vsub.s32 %v201_v18, %v203_v30 }
  0x3e   :  { %v140_v14 = vadd.f32 %v139_v50, %v138_v7  ;;  %v219_v7 = vsub.s32 0, %v203_v30 }
  0x3f   :  { %v170_v26 = vadd.f32 %v169_v19, %v168_v21  ;;  %v153_v20 = vadd.f32 %v152_v51, %v151_v48  ;;  %v223_v21 = vsub.s32 2, %v203_v30  ;;  %v227_v48 = vsub.s32 4, %v203_v30 }
  0x40   :  { %v176_v32 = vmul.f32 0.020408163, %v140_v14 }
  0x41   :  { %v171_v39 = vrot.slane %v170_v26, 1  ;;  %v177_v40 = vmul.f32 0.020408163, %v153_v20 }
  0x42   :  { %v182_v45 = vsub.f32 %v176_v32, %v179_v52 }
  0x43   :  { %v172_v56 = vadd.f32 %v171_v39, %v170_v26  ;;  %v183_v63 = vsub.f32 %v177_v40, %v180_v55 }
  0x44   :  { %v185_v11 = vmax.f32 %v182_v45, 0.0 }
  0x45   :  { %v178_v6 = vmul.f32 0.020408163, %v172_v56  ;;  %v186_v46 = vmax.f32 %v183_v63, 0.0 }
  0x46   :  { %v188_v53 = vadd.f32 1e-05, %v185_v11  ;;  %v297_v11 = vsub.s32 3, %v203_v30 }
  0x47   :  { %v184_v12 = vsub.f32 %v178_v6, %v181_v59  ;;  %v189_v13 = vadd.f32 1e-05, %v186_v46  ;;  %v293_v6 = vsub.s32 1, %v203_v30  ;;  %v301_v46 = vsub.s32 5, %v203_v30 }
  0x48   :  { %384 = vrsqrt.f32 %v188_v53 }
  0x49   :  { %v187_v23 = vmax.f32 %v184_v12, 0.0  ;;  %386 = vrsqrt.f32 %v189_v13 }
  0x4b   :  { %v190_v54 = vadd.f32 1e-05, %v187_v23 }
  0x4d   :  { %388 = vrsqrt.f32 %v190_v54 }
  0x55   :  { %v385_v58 = vpop.eup %384 }
  0x56   :  { %v387_v37 = vpop.eup %386 }
  0x57   :  { %v198_v60 = vcombine.low %v385_v58, %v387_v37 }
  0x59   :  { %v205_v61 = vrot.slane %v198_v60, %v204_v31 }
  0x5a   :  { %v389_v38 = vpop.eup %388 }
  0x5b   :  { %v212_v43 = vrot.slane %v389_v38, %v204_v31 }
  0x5d   :  { %v213_v44 = vcombine.low %v205_v61, %v212_v43 }
  0x5f   :  { %v215_v50 = vmul.f32 %v213_v44, %v194_v62 }
  0x61   :  { %v220_v19 = vrot.slane %v215_v50, %v219_v7  ;;  %v224_v51 = vrot.slane %v215_v50, %v223_v21  ;;  %v228_v14 = vrot.slane %v215_v50, %v227_v48 }
  0x63   :  { %v232_v26 = vmul.f32 %v220_v19, %v173_v47  ;;  %v233_v52 = vmul.f32 %v224_v51, %v174_v49  ;;  %v234_v20 = vmul.f32 %v228_v14, %v175_v33  ;;  %v260_v40 = vrot.slane %v220_v19, %v219_v7 }
  0x64   :  { %v264_v56 = vrot.slane %v224_v51, %v219_v7  ;;  %v268_v59 = vrot.slane %v228_v14, %v219_v7 }
  0x65   :  { %v238_v55 = vcombine.low %v232_v26, %v233_v52  ;;  %v252_v39 = vrot.slane %v234_v20, %v204_v31  ;;  %v269_v12 = vmul.f32 %v260_v40, %v486_v0  ;;  %v272_v47 = vmul.f32 %v260_v40, %v492_v3 }
  0x66   :  { %v270_v53 = vmul.f32 %v264_v56, %v488_v1  ;;  %v271_v13 = vmul.f32 %v268_v59, %v490_v2  ;;  %v273_v33 = vmul.f32 %v264_v56, %v494_v4  ;;  %v274_v23 = vmul.f32 %v268_v59, %v496_v5 }
  0x67   :  { %v245_v32 = vrot.slane %v238_v55, %v204_v31  ;;  %v275_v54 = vmul.f32 %v260_v40, %v502_v8  ;;  %v276_v24 = vmul.f32 %v264_v56, %v504_v9  ;;  %v277_v57 = vmul.f32 %v268_v59, %v506_v10 }
  0x68   :  { %v278_v25 = vmul.f32 %v260_v40, %v516_v15  ;;  %v279_v0 = vmul.f32 %v264_v56, %v518_v16  ;;  %v280_v3 = vmul.f32 %v268_v59, %v520_v17  ;;  %v281_v30 = vmul.f32 %v260_v40, %v536_v27 }
  0x69   :  { %v253_v45 = vcombine.low %v245_v32, %v252_v39  ;;  %v282_v4 = vmul.f32 %v264_v56, %v538_v28  ;;  %v283_v5 = vmul.f32 %v268_v59, %v528_v22  ;;  %v284_v8 = vmul.f32 %v260_v40, %v560_v41 }
  0x6a   :  { %v285_v15 = vmul.f32 %v264_v56, %v562_v42  ;;  %v286_v16 = vmul.f32 %v268_v59, %v540_v29  ;;  %v287_v31 = vmul.f32 %v260_v40, %v548_v34  ;;  %v288_v37 = vmul.f32 %v264_v56, %v550_v35 }
  0x6b   :  { %v254_v63 = vrot.slane %v253_v45, 7  ;;  %v289_v17 = vmul.f32 %v268_v59, %v552_v36 }
  0x6d   :  { %v256_v49 = vsub.f32 %v194_v62, %v254_v63 }
  0x6f   :  { %v294_v1 = vrot.slane %v256_v49, %v293_v6  ;;  %v298_v18 = vrot.slane %v256_v49, %v297_v11  ;;  %v302_v2 = vrot.slane %v256_v49, %v301_v46 }
  0x71   :  { %v309_v9 = vrot.slane %v294_v1, %v293_v6  ;;  %v313_v58 = vrot.slane %v298_v18, %v293_v6  ;;  %v317_v10 = vrot.slane %v302_v2, %v293_v6 }
  0x73   :  { %v318_v27 = vadd.f32 %v309_v9, %v269_v12  ;;  %v319_v60 = vadd.f32 %v313_v58, %v270_v53  ;;  %v320_v28 = vadd.f32 %v317_v10, %v271_v13  ;;  %v321_v38 = vadd.f32 %v309_v9, %v272_v47 }
  0x74   :  { %v322_v22 = vadd.f32 %v313_v58, %v273_v33  ;;  %v323_v61 = vadd.f32 %v317_v10, %v274_v23  ;;  %v324_v41 = vadd.f32 %v309_v9, %v275_v54  ;;  %v325_v43 = vadd.f32 %v313_v58, %v276_v24 }
  0x75   :  { %339 = vst [vmem:[#allocation7] sm:$0xff] %v318_v27  ;;  %340 = vst [vmem:[#allocation7 + $0x8] sm:$0xff] %v319_v60  ;;  %v326_v29 = vadd.f32 %v317_v10, %v277_v57  ;;  %v327_v42 = vadd.f32 %v309_v9, %v278_v25  ;;  %v328_v34 = vadd.f32 %v313_v58, %v279_v0 }
  0x76   :  { %341 = vst.msk [vmem:[#allocation7 + $0x10] sm:$0xff] %vm86_vm0, %v320_v28  ;;  %342 = vst [vmem:[#allocation7 + $0x18] sm:$0xff] %v321_v38  ;;  %v329_v62 = vadd.f32 %v317_v10, %v280_v3  ;;  %v330_v35 = vadd.f32 %v309_v9, %v281_v30  ;;  %v331_v36 = vadd.f32 %v313_v58, %v282_v4 }
  0x77   :  { %343 = vst [vmem:[#allocation7 + $0x20] sm:$0xff] %v322_v22  ;;  %344 = vst.msk [vmem:[#allocation7 + $0x28] sm:$0xff] %vm86_vm0, %v323_v61  ;;  %v332_v44 = vadd.f32 %v317_v10, %v283_v5  ;;  %v333_v7 = vadd.f32 %v309_v9, %v284_v8  ;;  %v334_v21 = vadd.f32 %v313_v58, %v285_v15 }
  0x78   :  { %345 = vst [vmem:[#allocation7 + $0x30] sm:$0xff] %v324_v41  ;;  %346 = vst [vmem:[#allocation7 + $0x38] sm:$0xff] %v325_v43  ;;  %v335_v48 = vadd.f32 %v317_v10, %v286_v16  ;;  %v336_v50 = vadd.f32 %v309_v9, %v287_v31  ;;  %v337_v19 = vadd.f32 %v313_v58, %v288_v37 }
  0x79   :  { %347 = vst.msk [vmem:[#allocation7 + $0x40] sm:$0xff] %vm86_vm0, %v326_v29  ;;  %348 = vst [vmem:[#allocation7 + $0x48] sm:$0xff] %v327_v42  ;;  %v338_v51 = vadd.f32 %v317_v10, %v289_v17 }
  0x7a   :  { %349 = vst [vmem:[#allocation7 + $0x50] sm:$0xff] %v328_v34  ;;  %350 = vst.msk [vmem:[#allocation7 + $0x58] sm:$0xff] %vm86_vm0, %v329_v62 }
  0x7b   :  { %351 = vst [vmem:[#allocation7 + $0x60] sm:$0xff] %v330_v35  ;;  %352 = vst [vmem:[#allocation7 + $0x68] sm:$0xff] %v331_v36 }
  0x7c   :  { %353 = vst.msk [vmem:[#allocation7 + $0x70] sm:$0xff] %vm86_vm0, %v332_v44  ;;  %354 = vst [vmem:[#allocation7 + $0x78] sm:$0xff] %v333_v7 }
  0x7d   :  { %355 = vst [vmem:[#allocation7 + $0x80] sm:$0xff] %v334_v21  ;;  %356 = vst.msk [vmem:[#allocation7 + $0x88] sm:$0xff] %vm86_vm0, %v335_v48 }
  0x7e   :  { %357 = vst [vmem:[#allocation7 + $0x90] sm:$0x1] %v336_v50  ;;  %358 = vst [vmem:[#allocation7 + $0x98] sm:$0x1] %v337_v19 }
  0x7f   :  { %359 = vst.msk [vmem:[#allocation7 + $0xa0] sm:$0x1] %vm98_vm2, %v338_v51 }
  0x80   :  { %441 = shalt.err (!%p438_p0)
}
  0x81   :  { %371 = dma.vmem_to_hbm [thread:$0]  %s366_s1, 2688, %s645_s2, [#allocation4], %s457_s12, %s457_s12, %s458_s13  }
  0x82   :  { %454 = dma.done.wait [#allocation4], 2688  }
  0x83   :  { %455 = vsyncadd [#allocation4], 4294964608 }
  0x84   :  { %375 = vsyncpa [#allocation3], 1 }
  0x85   :  { %376 = vsyncpa [#allocation6], 1 }
  0x86   :  { %377 = vsyncpa [#allocation4], 1 }

</bundles_post_ra>
